<compile_context>
chip_gen: v7x
topology: tpu7x:2x2x1
jax: 0.10.0
libtpu: 0.0.40
codegen_flags: <defaults>
</compile_context>

<pallas_src>
import functools

import jax
import jax.numpy as jnp
import numpy as np
from jax.experimental import pallas as pl
from jax.experimental.pallas import tpu as pltpu


def _st_kernel(src_ref, fy_ref, fx_ref, out_ref, *, C, H, W, TQ, CC):
    # src_ref : (1, C*W, H)  source, transposed to (C, W, H) and flattened.
    #                        Block index fixed along q -> resident across q tiles.
    # fy_ref  : (1, 1, TQ)   row displacement (flow[:, 0]) tile.
    # fx_ref  : (1, 1, TQ)   col displacement (flow[:, 1]) tile.
    # out_ref : (1, C, TQ)
    f32 = jnp.float32
    qi = pl.program_id(1)

    # Flat output-pixel index for this tile -> (row, col) pixel coordinates.
    lane = jax.lax.broadcasted_iota(jnp.int32, (1, TQ), 1)
    q = qi * TQ + lane                                    # (1, TQ) int32
    if (W & (W - 1)) == 0:                                # power-of-two fast path
        shift = int(W).bit_length() - 1
        row_i = q >> shift
        col_i = q & (W - 1)
    else:
        row_i = q // W
        col_i = q - row_i * W
    row = row_i.astype(f32)
    col = col_i.astype(f32)

    fy = fy_ref[0]                                        # (1, TQ)
    fx = fx_ref[0]                                        # (1, TQ)

    # Module normalization (divide by dim-1) fused with grid_sample
    # un-normalization (align_corners=False) == one FMA per axis, then the
    # 'border' padding clip.
    sy = float(H) / float(H - 1)
    sx = float(W) / float(W - 1)
    iy = jnp.clip((row + fy) * sy - 0.5, 0.0, float(H - 1))     # (1, TQ)
    ix = jnp.clip((col + fx) * sx - 0.5, 0.0, float(W - 1))     # (1, TQ)

    # Separable bilinear factors, hat/tent form (equivalent to the one-hot
    # wy0*(r==y0)+wy1*(r==y1) construction under the border clip).
    r_iota = jax.lax.broadcasted_iota(jnp.int32, (H, TQ), 0).astype(f32)
    Ry = jnp.maximum(0.0, 1.0 - jnp.abs(r_iota - iy))           # (H, TQ)
    x_iota = jax.lax.broadcasted_iota(jnp.int32, (W, TQ), 0).astype(f32)
    Cx = jnp.maximum(0.0, 1.0 - jnp.abs(x_iota - ix))           # (W, TQ)

    # Stage 1 (MXU, contract H) + stage 2 (weight by Cx, reduce W), chunked
    # over channels so the live intermediate stays <= ~128 KiB.
    for c0 in range(0, C, CC):
        c1 = min(C, c0 + CC)
        nb = c1 - c0
        blk = src_ref[0, c0 * W:c1 * W, :]                            # (nb*W, H)
        A = jnp.dot(blk, Ry, preferred_element_type=jnp.float32)      # (nb*W, TQ)
        A = A.reshape(nb, W, TQ) * Cx[None, :, :]
        out_ref[0, c0:c1, :] = jnp.sum(A, axis=1).astype(out_ref.dtype)


def _st_call(src, flow, *, tq):
    """src: (N, C, H, W), flow: (N, 2, H, W) -> (N, C, H, W).  Contracts H."""
    N, C, H, W = src.shape
    HW = H * W
    tq = max(128, ((int(tq) + 127) // 128) * 128)         # lane-dense multiple of 128
    n_tiles = -(-HW // tq)
    HW_pad = n_tiles * tq

    # Pre-transpose source to (C, W, H) and flatten to (C*W, H): stage-1 matmul
    # has K = H, and the output stays lane-dense in q.
    src_t = jnp.transpose(src, (0, 1, 3, 2)).reshape(N, C * W, H)
    fy = flow[:, 0].reshape(N, 1, HW)
    fx = flow[:, 1].reshape(N, 1, HW)
    if HW_pad != HW:
        pad = ((0, 0), (0, 0), (0, HW_pad - HW))
        fy = jnp.pad(fy, pad)
        fx = jnp.pad(fx, pad)

    # Channels per stage-2 chunk: keep the (cc*W, TQ) f32 intermediate <= ~128 KiB.
    rows_budget = max(W, (128 * 1024) // (tq * 4))
    cc = max(1, min(C, rows_budget // W))

    kernel = functools.partial(_st_kernel, C=C, H=H, W=W, TQ=tq, CC=cc)

    # Explicit VMEM budget: resident src block (double-buffered), small flow /
    # out blocks, Ry/Cx/A intermediates; clamped to stay safe on v7x (64 MiB).
    vmem_need = (2 * C * W * H * 4 + 8 * tq * 4 + 2 * C * tq * 4
                 + 8 * (H + W + cc * W) * tq * 4)
    vmem_limit = int(min(max(vmem_need, 32 << 20), 48 << 20))

    cost = pl.CostEstimate(
        flops=int(N * n_tiles * (2 * C * W * H * tq + 14 * (H + W) * tq)),
        transcendentals=0,
        bytes_accessed=int(N * (n_tiles * C * W * H * 4
                                + 2 * HW_pad * 4 + C * HW_pad * 4)),
    )

    out_flat = pl.pallas_call(
        kernel,
        out_shape=jax.ShapeDtypeStruct((N, C, HW_pad), src.dtype),
        grid=(N, n_tiles),                       # q innermost: src block stays resident
        in_specs=[
            pl.BlockSpec((1, C * W, H), lambda b, q: (b, 0, 0)),
            pl.BlockSpec((1, 1, tq), lambda b, q: (b, 0, q)),
            pl.BlockSpec((1, 1, tq), lambda b, q: (b, 0, q)),
        ],
        out_specs=pl.BlockSpec((1, C, tq), lambda b, q: (b, 0, q)),
        compiler_params=pltpu.CompilerParams(
            dimension_semantics=("parallel", "parallel"),
            vmem_limit_bytes=vmem_limit),
        cost_estimate=cost,
    )(src_t, fy, fx)

    return out_flat[:, :, :HW].reshape(N, C, H, W)


def spatial_transformer(src, flow, *, tq=256):
    """src: (N, C, H, W) float32, flow: (N, 2, H, W) float32 -> (N, C, H, W)."""
    N, C, H, W = src.shape
    assert flow.shape == (N, 2, H, W)
    # Same failure mode as the PyTorch original (divide by dim-1), made explicit.
    assert H > 1 and W > 1, "spatial dims must be > 1"

    if W > H:
        # Contract the LARGER spatial axis on the MXU: swap the roles of H and W
        # (and the two flow components), run the kernel, transpose back.
        src_s = jnp.transpose(src, (0, 1, 3, 2))
        flow_s = jnp.transpose(jnp.stack([flow[:, 1], flow[:, 0]], axis=1),
                               (0, 1, 3, 2))
        out_s = _st_call(src_s, flow_s, tq=tq)
        return jnp.transpose(out_s, (0, 1, 3, 2))
    return _st_call(src, flow, tq=tq)


def _reference(src, flow):
    """Plain-JAX reference mirroring F.grid_sample(bilinear, border, align_corners=False)."""
    N, C, H, W = src.shape
    iota_y = jnp.broadcast_to(jnp.arange(H, dtype=jnp.float32)[:, None], (H, W))
    iota_x = jnp.broadcast_to(jnp.arange(W, dtype=jnp.float32)[None, :], (H, W))
    p_y = iota_y[None] + flow[:, 0]
    p_x = iota_x[None] + flow[:, 1]
    ny = 2.0 * (p_y / (H - 1) - 0.5)
    nx = 2.0 * (p_x / (W - 1) - 0.5)
    iy = ((ny + 1.0) * H - 1.0) * 0.5
    ix = ((nx + 1.0) * W - 1.0) * 0.5
    iy = jnp.clip(iy, 0.0, H - 1.0)
    ix = jnp.clip(ix, 0.0, W - 1.0)
    y0 = jnp.floor(iy).astype(jnp.int32)
    x0 = jnp.floor(ix).astype(jnp.int32)
    y1 = jnp.minimum(y0 + 1, H - 1)
    x1 = jnp.minimum(x0 + 1, W - 1)
    wy1 = iy - y0
    wx1 = ix - x0
    wy0 = 1.0 - wy1
    wx0 = 1.0 - wx1

    def per_batch(src_b, y0b, y1b, x0b, x1b, wy0b, wy1b, wx0b, wx1b):
        g = lambda yi, xi: src_b[:, yi, xi]       # (C, H, W)
        return (wy0b * wx0b * g(y0b, x0b) + wy0b * wx1b * g(y0b, x1b)
                + wy1b * wx0b * g(y1b, x0b) + wy1b * wx1b * g(y1b, x1b))

    return jax.vmap(per_batch)(src, y0, y1, x0, x1, wy0, wy1, wx0, wx1)


if __name__ == "__main__":
    key = jax.random.PRNGKey(0)
    k1, k2, k3, k4 = jax.random.split(key, 4)

    # Primary shapes (square, power-of-two spatial dims).
    N, C, H, W = 2, 4, 16, 16
    src = jax.random.normal(k1, (N, C, H, W), dtype=jnp.float32)
    # Displacements up to a few pixels (including out-of-bounds to exercise 'border').
    flow = 3.0 * jax.random.normal(k2, (N, 2, H, W), dtype=jnp.float32)
    ref = _reference(src, flow)

    # Multi-tile q grid (HW=256, TQ=128 -> 2 q-tiles per batch element).
    out_a = jax.block_until_ready(spatial_transformer(src, flow, tq=128))
    np.testing.assert_allclose(np.asarray(out_a), np.asarray(ref), rtol=1e-5, atol=1e-5)

    # Default tile size (single q-tile here).
    out_b = jax.block_until_ready(spatial_transformer(src, flow))
    np.testing.assert_allclose(np.asarray(out_b), np.asarray(ref), rtol=1e-5, atol=1e-5)
    assert out_b.shape == (N, C, H, W)

    # Non-square W > H: exercises the contraction-axis swap, the non-power-of-two
    # row/col decode, and q padding (HW=288 -> padded to 384 with tq=128).
    H2, W2 = 12, 24
    src2 = jax.random.normal(k3, (N, C, H2, W2), dtype=jnp.float32)
    flow2 = 2.0 * jax.random.normal(k4, (N, 2, H2, W2), dtype=jnp.float32)
    out2 = jax.block_until_ready(spatial_transformer(src2, flow2, tq=128))
    np.testing.assert_allclose(np.asarray(out2), np.asarray(_reference(src2, flow2)),
                               rtol=1e-5, atol=1e-5)

    print("KERNEL_OK")
</pallas_src>

<mosaic_0001>
module attributes {stable_mosaic.version = 11 : i64} {
  func.func @_st_kernel(%arg0: i32, %arg1: i32, %arg2: memref<1x64x16xf32, #tpu.memory_space<vmem>>, %arg3: memref<1x1x128xf32, #tpu.memory_space<vmem>>, %arg4: memref<1x1x128xf32, #tpu.memory_space<vmem>>, %arg5: memref<1x4x128xf32, #tpu.memory_space<vmem>>) attributes {dimension_semantics = [#tpu.dimension_semantics<parallel>, #tpu.dimension_semantics<parallel>], iteration_bounds = array<i64: 2, 2>, scalar_prefetch = 0 : i64, scratch_operands = 0 : i64, tpu.core_type = #tpu.core_type<tc>, window_params = [{transform_indices = @transform_0, window_bounds = array<i64: 1, 64, 16>}, {transform_indices = @transform_1, window_bounds = array<i64: 1, 1, 128>}, {transform_indices = @transform_2, window_bounds = array<i64: 1, 1, 128>}, {transform_indices = @transform_3, window_bounds = array<i64: 1, 4, 128>}]} {
    %0 = tpu.iota {dimensions = array<i32: 1>} : vector<1x128xi32>
    %c128_i32 = arith.constant 128 : i32
    %1 = arith.muli %arg1, %c128_i32 : i32
    %2 = vector.broadcast %1 : i32 to vector<1x128xi32>
    %3 = arith.addi %2, %0 : vector<1x128xi32>
    %c4_i32 = arith.constant 4 : i32
    %4 = vector.broadcast %c4_i32 : i32 to vector<1x128xi32>
    %5 = arith.shrsi %3, %4 : vector<1x128xi32>
    %c15_i32 = arith.constant 15 : i32
    %6 = vector.broadcast %c15_i32 : i32 to vector<1x128xi32>
    %7 = arith.andi %3, %6 : vector<1x128xi32>
    %8 = arith.sitofp %5 : vector<1x128xi32> to vector<1x128xf32>
    %9 = arith.sitofp %7 : vector<1x128xi32> to vector<1x128xf32>
    %c0 = arith.constant 0 : index
    %c0_0 = arith.constant 0 : index
    %c0_1 = arith.constant 0 : index
    %10 = vector.load %arg3[%c0, %c0_0, %c0_1] : memref<1x1x128xf32, #tpu.memory_space<vmem>>, vector<1x1x128xf32>
    %11 = vector.shape_cast %10 : vector<1x1x128xf32> to vector<1x128xf32>
    %c0_2 = arith.constant 0 : index
    %c0_3 = arith.constant 0 : index
    %c0_4 = arith.constant 0 : index
    %12 = vector.load %arg4[%c0_2, %c0_3, %c0_4] : memref<1x1x128xf32, #tpu.memory_space<vmem>>, vector<1x1x128xf32>
    %13 = vector.shape_cast %12 : vector<1x1x128xf32> to vector<1x128xf32>
    %14 = arith.addf %8, %11 : vector<1x128xf32>
    %cst = arith.constant 1.06666672 : f32
    %15 = vector.broadcast %cst : f32 to vector<1x128xf32>
    %16 = arith.mulf %14, %15 : vector<1x128xf32>
    %cst_5 = arith.constant 5.000000e-01 : f32
    %17 = vector.broadcast %cst_5 : f32 to vector<1x128xf32>
    %18 = arith.subf %16, %17 : vector<1x128xf32>
    %cst_6 = arith.constant 0.000000e+00 : f32
    %cst_7 = arith.constant 1.500000e+01 : f32
    %19 = vector.broadcast %cst_6 : f32 to vector<1x128xf32>
    %20 = arith.maximumf %19, %18 : vector<1x128xf32>
    %21 = vector.broadcast %cst_7 : f32 to vector<1x128xf32>
    %22 = arith.minimumf %21, %20 : vector<1x128xf32>
    %23 = arith.addf %9, %13 : vector<1x128xf32>
    %cst_8 = arith.constant 1.06666672 : f32
    %24 = vector.broadcast %cst_8 : f32 to vector<1x128xf32>
    %25 = arith.mulf %23, %24 : vector<1x128xf32>
    %cst_9 = arith.constant 5.000000e-01 : f32
    %26 = vector.broadcast %cst_9 : f32 to vector<1x128xf32>
    %27 = arith.subf %25, %26 : vector<1x128xf32>
    %cst_10 = arith.constant 0.000000e+00 : f32
    %cst_11 = arith.constant 1.500000e+01 : f32
    %28 = vector.broadcast %cst_10 : f32 to vector<1x128xf32>
    %29 = arith.maximumf %28, %27 : vector<1x128xf32>
    %30 = vector.broadcast %cst_11 : f32 to vector<1x128xf32>
    %31 = arith.minimumf %30, %29 : vector<1x128xf32>
    %32 = tpu.iota {dimensions = array<i32: 0>} : vector<16x128xi32>
    %33 = arith.sitofp %32 : vector<16x128xi32> to vector<16x128xf32>
    %34 = vector.broadcast %22 : vector<1x128xf32> to vector<16x128xf32>
    %35 = arith.subf %33, %34 : vector<16x128xf32>
    %36 = math.absf %35 : vector<16x128xf32>
    %cst_12 = arith.constant 1.000000e+00 : f32
    %37 = vector.broadcast %cst_12 : f32 to vector<16x128xf32>
    %38 = arith.subf %37, %36 : vector<16x128xf32>
    %cst_13 = arith.constant 0.000000e+00 : f32
    %39 = vector.broadcast %cst_13 : f32 to vector<16x128xf32>
    %40 = arith.maximumf %39, %38 : vector<16x128xf32>
    %41 = tpu.iota {dimensions = array<i32: 0>} : vector<16x128xi32>
    %42 = arith.sitofp %41 : vector<16x128xi32> to vector<16x128xf32>
    %43 = vector.broadcast %31 : vector<1x128xf32> to vector<16x128xf32>
    %44 = arith.subf %42, %43 : vector<16x128xf32>
    %45 = math.absf %44 : vector<16x128xf32>
    %cst_14 = arith.constant 1.000000e+00 : f32
    %46 = vector.broadcast %cst_14 : f32 to vector<16x128xf32>
    %47 = arith.subf %46, %45 : vector<16x128xf32>
    %cst_15 = arith.constant 0.000000e+00 : f32
    %48 = vector.broadcast %cst_15 : f32 to vector<16x128xf32>
    %49 = arith.maximumf %48, %47 : vector<16x128xf32>
    %c0_16 = arith.constant 0 : index
    %c0_17 = arith.constant 0 : index
    %c0_18 = arith.constant 0 : index
    %50 = vector.load %arg2[%c0_16, %c0_17, %c0_18] : memref<1x64x16xf32, #tpu.memory_space<vmem>>, vector<1x64x16xf32>
    %51 = vector.shape_cast %50 : vector<1x64x16xf32> to vector<64x16xf32>
    %cst_19 = arith.constant dense<0.000000e+00> : vector<64x128xf32>
    %52 = tpu.matmul %51, %40, %cst_19 {dimension_numbers = #tpu.dot_dimension_numbers<[1], [0], [0], [1], [0, 0, 1, 1], [], []>} : vector<64x16xf32>, vector<16x128xf32>, vector<64x128xf32> -> vector<64x128xf32>
    %53 = vector.shape_cast %52 : vector<64x128xf32> to vector<4x16x128xf32>
    %54 = vector.shape_cast %49 : vector<16x128xf32> to vector<1x16x128xf32>
    %55 = vector.broadcast %54 : vector<1x16x128xf32> to vector<4x16x128xf32>
    %56 = arith.mulf %53, %55 : vector<4x16x128xf32>
    %cst_20 = arith.constant dense<0.000000e+00> : vector<4x128xf32>
    %57 = vector.multi_reduction <add>, %56, %cst_20 [1] : vector<4x16x128xf32> to vector<4x128xf32>
    %c0_21 = arith.constant 0 : index
    %c0_22 = arith.constant 0 : index
    %c0_23 = arith.constant 0 : index
    %58 = vector.load %arg5[%c0_21, %c0_22, %c0_23] : memref<1x4x128xf32, #tpu.memory_space<vmem>>, vector<1x4x128xf32>
    %59 = vector.shape_cast %58 : vector<1x4x128xf32> to vector<4x128xf32>
    %60 = vector.shape_cast %57 : vector<4x128xf32> to vector<1x4x128xf32>
    tpu.vector_store %arg5[%c0_21, %c0_22, %c0_23], %60 {strides = array<i32>} : memref<1x4x128xf32, #tpu.memory_space<vmem>>, vector<1x4x128xf32>,
    return
  }
  func.func @transform_0(%arg0: i32, %arg1: i32) -> (i32, i32, i32) {
    %c0_i32 = arith.constant 0 : i32
    %c0_i32_0 = arith.constant 0 : i32
    %c0_i32_1 = arith.constant 0 : i32
    return %arg0, %c0_i32, %c0_i32_0 : i32, i32, i32
  }
  func.func @transform_1(%arg0: i32, %arg1: i32) -> (i32, i32, i32) {
    %c0_i32 = arith.constant 0 : i32
    %c0_i32_0 = arith.constant 0 : i32
    return %arg0, %c0_i32, %arg1 : i32, i32, i32
  }
  func.func @transform_2(%arg0: i32, %arg1: i32) -> (i32, i32, i32) {
    %c0_i32 = arith.constant 0 : i32
    %c0_i32_0 = arith.constant 0 : i32
    return %arg0, %c0_i32, %arg1 : i32, i32, i32
  }
  func.func @transform_3(%arg0: i32, %arg1: i32) -> (i32, i32, i32) {
    %c0_i32 = arith.constant 0 : i32
    %c0_i32_0 = arith.constant 0 : i32
    return %arg0, %c0_i32, %arg1 : i32, i32, i32
  }
}

</mosaic_0001>

<bundles_post_ra>
// kernel: tpu_custom_call.1
= control target key start
LH: loop header
LB: loop body
LE: loop exit
PB: predicated region body
PF: predicated region fallthrough
CT: control target
= control target key end

     0   :  { %8 = vsyncpa [#allocation3], 0  ;;  %s1006_s0 = inlined_call_operand.vmem [shape: f32[2,64,16], index: 0, kind: input, shape index: {}]   ;;  %s1007_s1 = inlined_call_operand.vmem [shape: f32[2,1,256], index: 1, kind: input, shape index: {}]   ;;  %s1008_s2 = inlined_call_operand.vmem [shape: f32[2,1,256], index: 2, kind: input, shape index: {}]   ;;  %s1009_s3 = inlined_call_operand.hbm [shape: f32[2,4,256], index: 3, kind: output, shape index: {}]  }
   0x1   :  { %10 = vsyncpa [#allocation3 + $0x1], 0  ;;  %s840_s12 = smov 0   ;;  %s842_s13 = smov 0  }
   0x2   :  { %s844_s14 = smov 0   ;;  %s846_s15 = smov 0  }
   0x3   :  { %s848_s16 = smov 0   ;;  %s850_s17 = smov 0  }
   0x4   :  { %s852_s18 = smov 0   ;;  %s854_s19 = smov 0  }
   0x5 LB: > { %s593_s20 = sadd.s32 4294967295, %s817_s19   ;;  %s594_s21 = sadd.s32 4294967294, %s817_s19   ;;  %s817_s19 = sphi %s854_s19, %s16_s19   ;;  %s813_s18 = sphi %s852_s18, %s1018_s18   ;;  %s809_s17 = sphi %s850_s17, %s1017_s17   ;;  %s805_s16 = sphi %s848_s16, %s1016_s16   ;;  %s801_s15 = sphi %s846_s15, %s1015_s15   ;;  %s797_s14 = sphi %s844_s14, %s1014_s14   ;;  %s793_s13 = sphi %s842_s13, %s1013_s13   ;;  %s789_s12 = sphi %s840_s12, %s1012_s12  }
   0x6   : > { %s25_s22 = sadd.s32 1, %s809_s17  ;;  %s28_s23 = sadd.s32 1, %s813_s18 }
   0x7   : > { %p26_p0 = scmp.ge.s32.totalorder %s25_s22, 2  ;;  %p129_p1 = scmp.ne.s32.totalorder %s797_s14, %s793_s13 }
   0x8   : > { %p130_p2 = scmp.eq.s32.totalorder %s593_s20, 3  ;;  %p135_p5 = scmp.ne.s32.totalorder %s793_s13, %s789_s12 }
   0x9   : > { %s1020_s22 = smov (%p26_p0, %s25_s22), 0  ;;  %s1022_s23 = smov (!%p26_p0, %s28_s23), %s813_s18 }
   0xa   : > { %s115_s24 = ssub.s32 %s809_s17, %s1020_s22  ;;  %p891_p3 = por %p130_p2, %p129_p1 }
   0xb   : > { %p30_p4 = scmp.ge.s32.totalorder %s1022_s23, 2  ;;  %p136_p6 = scmp.eq.s32.totalorder %s594_s21, 3 }
   0xc   : > { %p597_p7 = scmp.ge.s32.totalorder %s817_s19, 1  ;;  %p182_p9 = scmp.lt.s32.totalorder %s817_s19, 5 }
   0xd   : > { %s1024_s23 = smov (%p30_p4, %s1022_s23), 0  ;;  %p900_p8 = por %p136_p6, %p135_p5 }
   0xe   : > { %s114_s27 = ssub.s32 %s813_s18, %s1024_s23  ;;  %s119_s28 = sadd.s32 1, %s797_s14 }
   0xf   : > { %s116_s29 = sor.u32 %s115_s24, %s114_s27  ;;  %p183_p10 = pnand %p597_p7, %p182_p9 }
  0x10   : > { %p117_p11 = scmp.eq.s32.totalorder %s116_s29, 0  ;;  %p220_p12 = scmp.lt.s32.totalorder (!%p183_p10), %s805_s16, 1  ;;  %v239_v0 = vlaneseq (!%p183_p10)  ;;  %vm297_vm0 = vcmask (!%p183_p10), 130048   ;;  %vm467_vm1 = vcmask (!%p183_p10), 1041409   ;;  %vm469_vm2 = vcmask (!%p183_p10), 1042434  }
  0x11   : > { %186 = sbr.rel (%p183_p10) target bundleno = 307 (0x133), region = 32  ;;  %p227_p13 = scmp.lt.s32.totalorder (!%p183_p10), %s801_s15, 1  ;;  %vm471_vm3 = vcmask (!%p183_p10), 1043459  }
  0x12   : > { %s909_s30 = scalar_select %p117_p11, %s797_s14, %s119_s28  }
  0x13   : > { %s603_s4 = sshll.u32 (!%p183_p10), %s801_s15, 7  ;;  %v240_v1 = vand.u32 (!%p183_p10), 127, %v239_v0  ;;  %v261_v13 = vshrl.u32 (!%p183_p10), %v239_v0, 7 }
  0x14   : > { %v242_v2 = vstv (!%p183_p10), %s603_s4 }
  0x15   : > { %v243_v3 = vadd.s32 (!%p183_p10), %v242_v2, %v240_v1  ;;  %v262_v18 = vadd.s32 (!%p183_p10), 8, %v261_v13  ;;  %v267_v21 = vsub.s32 (!%p183_p10), 0, %v261_v13  ;;  %v263_v24 = vcvt.s32.f32 (!%p183_p10), %v261_v13 }
  0x17   : > { %v244_v4 = vshra.s32 (!%p183_p10), %v243_v3, 4  ;;  %v245_v7 = vand.u32 (!%p183_p10), 15, %v243_v3  ;;  %v264_v25 = vcvt.s32.f32 (!%p183_p10), %v262_v18 }
  0x18   : > { %s221_s5 = scalar_select %p220_p12, %s805_s16, 1 }
  0x19   : > { %s228_s6 = scalar_select %p227_p13, %s801_s15, 1  ;;  %v246_v9 = vcvt.s32.f32 %v244_v4  ;;  %v247_v10 = vcvt.s32.f32 %v245_v7 }
  0x1a   : > { %s601_s7 = sshll.u32 %s221_s5, 1  ;;  %s619_s8 = sshll.u32 %s221_s5, 6 }
  0x1b   : > { %s230_s9 = sadd.s32 %s601_s7, %s228_s6  ;;  %s919_s20 = scalar_lea.vmem %s1006_s0, %s619_s8 }
  0x1c   : > { %s231_s27 = scalar_lea.vmem %s1007_s1, %s230_s9  ;;  %v289_v5 = vld [vmem:[%s919_s20] sm:$0xff]  ;;  %s238_s4 = scalar_lea.vmem %s1008_s2, %s230_s9  ;;  %v290_v39 = vld [vmem:[%s919_s20 + $0x8] sm:$0xff]  ;;  %v291_v41 = vld [vmem:[%s919_s20 + $0x10] sm:$0xff] }
  0x1d   : > { %v293_v6 = vld [vmem:[%s919_s20 + $0x20] sm:$0xff]  ;;  %634 = vmatprep.mubr.msk.f32.mxu0 %vm297_vm0, %v289_v5  ;;  %v294_v40 = vld [vmem:[%s919_s20 + $0x28] sm:$0xff]  ;;  %v295_v42 = vld [vmem:[%s919_s20 + $0x30] sm:$0xff]  ;;  %s217_s5 = sand.u32 1, %s793_s13   ;;  %s615_s7 = sshll.u32 %s805_s16, 1 }
  0x1e   : > { %v248_v8 = vld [vmem:[%s231_s27] sm:$0x1]  ;;  %640 = vmatprep.mubr.msk.f32.mxu1 %vm297_vm0, %v293_v6  ;;  %v292_v43 = vld [vmem:[%s919_s20 + $0x18] sm:$0xff]  ;;  %s598_s6 = sshll.u32 %s217_s5, 2  ;;  %s487_s8 = sadd.s32 %s801_s15, %s615_s7 }
  0x1f   : > { %v249_v11 = vld [vmem:[%s238_s4] sm:$0x1]  ;;  %v250_v12 = vadd.f32 %v248_v8, %v246_v9  ;;  %v296_v44 = vld [vmem:[%s919_s20 + $0x38] sm:$0xff]  ;;  %s616_s9 = sshll.u32 %s487_s8, 6  ;;  %s219_s10 = scalar_lea.vmem [#allocation2], %s598_s6 }
  0x20   : > { %v255_v14 = vadd.f32 %v249_v11, %v247_v10  ;;  %s491_s11 = sshll.u32 %s219_s10, 4  ;;  %s951_s15 = scalar_lea.hbm %s1009_s3, %s616_s9  ;;  %s953_s11 = int_to_ptr.vmem [resolvable:$true] %s491_s11 }
  0x21   : > { %v251_v15 = vmul.f32 1.0666667, %v250_v12  ;;  %s476_s21 = scalar_lea.sflag [#allocation3], %s217_s5  ;;  %s723_s24 = scalar_lea.vmem %s953_s11, 64 }
  0x22   : > { %v256_v16 = vmul.f32 1.0666667, %v255_v14  ;;  %p724_p0 = scmp.ne.s32.totalorder %s953_s11, %s723_s24  ;;  %s819_s27 = smov [#allocation2]  }
  0x23   : > { %v604_v17 = vadd.f32 -0.5, %v251_v15  ;;  %s727_s28 = sshll.u32 %s819_s27, 4  ;;  %s728_s28 = int_to_ptr.vmem [resolvable:$false] %s727_s28 }
  0x24   : > { %v605_v19 = vadd.f32 -0.5, %v256_v16  ;;  %p725_p1 = pnand %p724_p0, %p891_p3  ;;  %s729_s29 = scalar_lea.vmem %s728_s28, 128 }
  0x25   : > { %v253_v20 = vmax.f32 %v604_v17, 0.0  ;;  %p730_p4 = scmp.lt.s32.totalorder %s953_s11, %s728_s28  ;;  %p731_p5 = scmp.lt.s32.totalorder %s729_s29, %s723_s24 }
  0x26   : > { %v258_v22 = vmax.f32 %v605_v19, 0.0  ;;  %p726_p2 = pneg %p725_p1 }
  0x27   : > { %v254_v23 = vmin.f32 %v253_v20, 15.0  ;;  %p732_p6 = por %p731_p5, %p730_p4 }
  0x28   : > { %v259_v26 = vmin.f32 %v258_v22, 15.0 }
  0x29   : > { %v268_v27 = vrot.slane %v254_v23, %v267_v21  ;;  %p733_p7 = pnand %p732_p6, %p726_p2 }
  0x2a   : > { %v280_v28 = vrot.slane %v259_v26, %v267_v21 }
  0x2b   : > { %v269_v29 = vsub.f32 %v263_v24, %v268_v27  ;;  %v270_v30 = vsub.f32 %v264_v25, %v268_v27 }
  0x2c   : > { %v282_v31 = vsub.f32 %v264_v25, %v280_v28  ;;  %v281_v45 = vsub.f32 %v263_v24, %v280_v28 }
  0x2d   : > { %v271_v32 = vand.u32 2147483647, %v269_v29  ;;  %v272_v33 = vand.u32 2147483647, %v270_v30 }
  0x2e   : > { %v284_v46 = vand.u32 2147483647, %v282_v31  ;;  %v283_v47 = vand.u32 2147483647, %v281_v45 }
  0x2f   : > { %v273_v34 = vsub.f32 1.0, %v271_v32  ;;  %v274_v35 = vsub.f32 1.0, %v272_v33 }
  0x30   : > { %v286_v48 = vsub.f32 1.0, %v284_v46  ;;  %v285_v49 = vsub.f32 1.0, %v283_v47 }
  0x31   : > { %v275_v36 = vmax.f32 %v273_v34, 0.0  ;;  %v276_v37 = vmax.f32 %v274_v35, 0.0 }
  0x32   : > { %v288_v50 = vmax.f32 %v286_v48, 0.0  ;;  %v287_v51 = vmax.f32 %v285_v49, 0.0 }
  0x33   : > { %v646_v38 = vpack.c.bf16 %v276_v37, %v275_v36 }
  0x35   : > { %647 = vmatprep.subr.bf16.mxu0 %v646_v38  ;;  %650 = vmatprep.subr.bf16.mxu1 %v646_v38 }
  0x36   : > { %649 = vmatpush3.bf16.msra.mxu0 %v646_v38  ;;  %651 = vmatpush3.bf16.msra.mxu1 %v646_v38 }
  0x39   : > { %635 = vmatmul.mubr.msk.f32.vlgmr.msra.gmra.mrb[0].mxu0 %vm297_vm0, %v290_v39  ;;  %641 = vmatmul.mubr.msk.f32.vlgmr.msra.gmra.mrb[0].mxu1 %vm297_vm0, %v294_v40 }
  0x3a   : > { %637 = vmatprep.mubr.msk.f32.mxu0 %vm297_vm0, %v291_v41  ;;  %643 = vmatprep.mubr.msk.f32.mxu1 %vm297_vm0, %v295_v42 }
  0x3d   : > { %638 = vmatmul.mubr.msk.f32.gmra.mrb[2].mxu0 %vm297_vm0, %v292_v43  ;;  %644 = vmatmul.mubr.msk.f32.gmra.mrb[2].mxu1 %vm297_vm0, %v296_v44 }
 0x10c   : > { %v636_v52 = vpop.f32.mrb[0].mxu0  ;;  %v642_v53 = vpop.f32.mrb[0].mxu1 }
 0x10d   : > { %v428_v54 = vmul.f32 %v636_v52, %v288_v50  ;;  %v432_v55 = vmul.f32 %v642_v53, %v288_v50  ;;  %v388_v56 = vpop.f32.mrb[1].mxu0  ;;  %v408_v57 = vpop.f32.mrb[1].mxu1 }
 0x10e   : > { %v427_v58 = vmul.f32 %v388_v56, %v287_v51  ;;  %v431_v59 = vmul.f32 %v408_v57, %v287_v51 }
 0x110   : > { %v435_v60 = vadd.f32 %v428_v54, %v427_v58  ;;  %v449_v61 = vadd.f32 %v432_v55, %v431_v59  ;;  %v639_v62 = vpop.f32.mrb[2].mxu0  ;;  %v645_v63 = vpop.f32.mrb[2].mxu1 }
 0x111   : > { %v430_v0 = vmul.f32 %v639_v62, %v288_v50  ;;  %v434_v1 = vmul.f32 %v645_v63, %v288_v50  ;;  %v398_v2 = vpop.f32.mrb[3].mxu0  ;;  %v418_v3 = vpop.f32.mrb[3].mxu1 }
 0x112   : > { %v436_v4 = vrot.slane %v435_v60, 4  ;;  %v450_v5 = vrot.slane %v449_v61, 4  ;;  %v429_v6 = vmul.f32 %v398_v2, %v287_v51  ;;  %v433_v7 = vmul.f32 %v418_v3, %v287_v51 }
 0x114   : > { %v437_v8 = vadd.f32 %v436_v4, %v435_v60  ;;  %v451_v9 = vadd.f32 %v450_v5, %v449_v61  ;;  %v442_v10 = vadd.f32 %v430_v0, %v429_v6  ;;  %v456_v11 = vadd.f32 %v434_v1, %v433_v7 }
 0x116   : > { %v438_v12 = vrot.slane %v437_v8, 2  ;;  %v452_v13 = vrot.slane %v451_v9, 2  ;;  %v443_v14 = vrot.slane %v442_v10, 4  ;;  %v457_v15 = vrot.slane %v456_v11, 4 }
 0x118   : > { %v439_v16 = vadd.f32 %v438_v12, %v437_v8  ;;  %v444_v17 = vadd.f32 %v443_v14, %v442_v10  ;;  %v458_v18 = vadd.f32 %v457_v15, %v456_v11  ;;  %v453_v19 = vadd.f32 %v452_v13, %v451_v9 }
 0x11a   : > { %v445_v20 = vrot.slane %v444_v17, 2  ;;  %v459_v21 = vrot.slane %v458_v18, 2  ;;  %v440_v22 = vrot.slane %v439_v16, 1  ;;  %v454_v25 = vrot.slane %v453_v19, 1 }
 0x11c   : > { %v446_v23 = vadd.f32 %v445_v20, %v444_v17  ;;  %v460_v24 = vadd.f32 %v459_v21, %v458_v18  ;;  %v441_v28 = vadd.f32 %v440_v22, %v439_v16  ;;  %v455_v30 = vadd.f32 %v454_v25, %v453_v19 }
 0x11e   : > { %v447_v26 = vrot.slane %v446_v23, 1  ;;  %v461_v27 = vrot.slane %v460_v24, 1 }
 0x120   : > { %v448_v29 = vadd.f32 %v447_v26, %v446_v23  ;;  %v462_v31 = vadd.f32 %v461_v27, %v460_v24 }
 0x122   : > { %v468_v32 = vsel %vm467_vm1, %v448_v29, %v441_v28 }
 0x123   : > { %v470_v33 = vsel %vm469_vm2, %v455_v30, %v468_v32 }
 0x124   : > { %v472_v34 = vsel %vm471_vm3, %v462_v31, %v470_v33 }
 0x125   : > { %474 = vst [vmem:[%s219_s10] sm:$0xf] %v472_v34 }
 0x126   : > { %736 = shalt.err (!%p733_p7)
}
 0x127   : > { %s737_s4 = scalar_lea.hbm %s951_s15, 64  ;;  %s741_s7 = scalar_lea.hbm %s1009_s3, 256 }
 0x128   : > { %p738_p9 = scmp.ne.s32.totalorder %s951_s15, %s737_s4  ;;  %p742_p12 = scmp.lt.u32.totalorder %s951_s15, %s1009_s3 }
 0x129   : > { %p743_p13 = scmp.lt.u32.totalorder %s741_s7, %s737_s4  ;;  %p745_p1 = scmp.lt.u32.totalorder %s737_s4, %s951_s15 }
 0x12a   : > { %p739_p10 = pnand %p738_p9, %p891_p3 }
 0x12b   : > { %p744_p0 = por %p743_p13, %p742_p12 }
 0x12c   : > { %p740_p11 = pneg %p739_p10 }
 0x12d   : > { %p746_p2 = por %p745_p1, %p744_p0 }
 0x12f   : > { %p747_p4 = pnand %p746_p2, %p740_p11 }
 0x131   : > { %750 = shalt.err (!%p747_p4)
}
 0x132   : > { %652 = dma.vmem_to_hbm [thread:$0]  (%p891_p3), %s953_s11, 64, %s951_s15, %s476_s21  }
 0x133 PF: > { %p658_p5 = scmp.ge.s32.totalorder %s817_s19, 2  ;;  %s503_s10 = sand.u32 1, %s789_s12  }
 0x134   : > { %s504_s16 = scalar_lea.sflag [#allocation3], %s503_s10 }
 0x135   : > { %p655_p6 = pnand %p658_p5, %p900_p8 }
 0x137   : > { %784 = dma.done.wait (!%p655_p6), %s504_s16, 64  }
 0x138   : > { %786 = vsyncadd (!%p655_p6), %s504_s16, 4294967232  ;;  %s16_s19 = sadd.s32 1, %s817_s19   ;;  %s1012_s12 = smov %s793_s13 }
 0x139   : > { %p13_p7 = scmp.ge.s32.totalorder %s16_s19, 6   ;;  %s1013_s13 = smov %s797_s14 }
 0x13a   : > { %s1014_s14 = smov %s909_s30  ;;  %s1015_s15 = smov %s809_s17 }
 0x13b   : > { %s1016_s16 = smov %s813_s18  ;;  %s1017_s17 = smov %s1020_s22 }
 0x13c   : > { %s1018_s18 = smov %s1024_s23  ;;  %15 = sbr.rel (!%p13_p7) target bundleno = 5 (0x5), region = 73 }
 0x143   :  { %509 = vsyncpa [#allocation3], 1 }
 0x144   :  { %511 = vsyncpa [#allocation3 + $0x1], 1 }

</bundles_post_ra>
